<compile_context>
chip_gen: v7x
topology: tpu7x:2x2x1
jax: 0.10.0
libtpu: 0.0.40
codegen_flags: <defaults>
</compile_context>

<pallas_src>
import functools

import jax
import jax.numpy as jnp
import numpy as np
from jax.experimental import pallas as pl
from jax.experimental.pallas import tpu as pltpu


# ----------------------------- Pallas kernel --------------------------------
def _decoder_kernel(seq_len, hidden_dim,
                    x_ref, w_ih_ref, w_hh_ref, b_ref, w_d_ref, b_d_ref,
                    out_ref):
    H = hidden_dim
    x = x_ref[...]                                            # (1, D)
    w_hh = w_hh_ref[...]                                      # (H, 4H)
    w_d = w_d_ref[...]                                        # (1, H)

    # Input is identical at every timestep (x was repeated), so the fused
    # input projection of all 4 gates (+ both LSTM biases) is computed once
    # and reused for every step of the recurrence.
    x_gates = (jnp.dot(x, w_ih_ref[...],
                       preferred_element_type=jnp.float32)
               + b_ref[...])                                  # (1, 4H)

    lane = jax.lax.broadcasted_iota(jnp.int32, (1, seq_len), 1)

    h = jnp.zeros((1, H), jnp.float32)
    c = jnp.zeros((1, H), jnp.float32)
    y = jnp.zeros((1, seq_len), jnp.float32)

    # seq_len is a small static value -> unrolled sequential recurrence; the
    # live state (h, c, y) is well under one vreg so register pressure is a
    # non-issue.
    # TODO(synk): for seq_len >> 16, switch to lax.fori_loop(unroll=k)
    # carrying (h, c, y) to bound live vreg ranges.
    for t in range(seq_len):
        # Single fused (1,H)@(H,4H) recurrent matmul per step (1 MXU push).
        gates = x_gates + jnp.dot(h, w_hh,
                                  preferred_element_type=jnp.float32)  # (1, 4H)
        sig = jax.nn.sigmoid(gates)          # one wide EUP pass covers i, f, o
        g = jnp.tanh(gates[:, 2 * H:3 * H])
        i = sig[:, 0 * H:1 * H]
        f = sig[:, 1 * H:2 * H]
        o = sig[:, 3 * H:4 * H]
        c = f * c + i * g
        h = o * jnp.tanh(c)
        # Linear(H, 1) folded into the loop; deposit y_t at (static) lane t so
        # the output is produced lane-dense as (1, seq_len).  y_t is not on the
        # h/c dependency chain, so this reduce/select is hidden under the
        # next step's MXU/EUP latency.
        y_t = jnp.sum(h * w_d, axis=-1, keepdims=True)        # (1, 1)
        y = y + jnp.where(lane == t, y_t, 0.0)

    # Single dense (1, seq_len) store; dense-layer bias added once at the end.
    out_ref[...] = y + b_d_ref[...]                           # (1, seq_len)


# ------------------------------ JAX wrapper ----------------------------------
def decoder_forward(x, kparams, *, seq_len, hidden_dim):
    kernel = functools.partial(_decoder_kernel, seq_len, hidden_dim)
    vmem = pl.BlockSpec(memory_space=pltpu.MemorySpace.VMEM)
    # TODO(synk): if many latents are decoded at once, batch x to (B, D) and
    # add a "parallel" grid axis over B (engages the 2nd TensorCore on v7x).
    return pl.pallas_call(
        kernel,
        out_shape=jax.ShapeDtypeStruct((1, seq_len), jnp.float32),
        in_specs=[vmem] * 6,
        out_specs=vmem,
    )(x, kparams["w_ih_cat"], kparams["w_hh_cat"], kparams["b_cat"],
      kparams["w_d_row"], kparams["b_d"])


# ---------------------- deterministic parameter setup ------------------------
def init_params(key, input_dim, hidden_dim):
    """PyTorch-shaped params (LSTM weight_ih/weight_hh/biases + Linear)."""
    k = 1.0 / np.sqrt(hidden_dim)
    ks = jax.random.split(key, 6)
    raw = dict(
        w_ih=jax.random.uniform(ks[0], (4 * hidden_dim, input_dim), jnp.float32, -k, k),
        w_hh=jax.random.uniform(ks[1], (4 * hidden_dim, hidden_dim), jnp.float32, -k, k),
        b_ih=jax.random.uniform(ks[2], (4 * hidden_dim,), jnp.float32, -k, k),
        b_hh=jax.random.uniform(ks[3], (4 * hidden_dim,), jnp.float32, -k, k),
        w_d=jax.random.uniform(ks[4], (1, hidden_dim), jnp.float32, -k, k),
        b_d=jax.random.uniform(ks[5], (1,), jnp.float32, -k, k),
    )
    # Kernel layout: fused gate weights, pre-transposed for (row) @ (F, 4H).
    # Column order follows PyTorch gate order i | f | g | o.
    kparams = dict(
        w_ih_cat=raw["w_ih"].T,                              # (D, 4H)
        w_hh_cat=raw["w_hh"].T,                              # (H, 4H)
        b_cat=(raw["b_ih"] + raw["b_hh"]).reshape(1, 4 * hidden_dim),
        w_d_row=raw["w_d"],                                  # (1, H)
        b_d=raw["b_d"].reshape(1, 1),
    )
    return raw, kparams


# --------------------------- pure-JAX reference -------------------------------
def decoder_ref(x, raw, *, seq_len, hidden_dim):
    H = hidden_dim
    h = jnp.zeros((1, H), jnp.float32)
    c = jnp.zeros((1, H), jnp.float32)
    ys = []
    for _ in range(seq_len):
        gates = (x @ raw["w_ih"].T + raw["b_ih"]
                 + h @ raw["w_hh"].T + raw["b_hh"])          # (1, 4H)
        i = jax.nn.sigmoid(gates[:, 0 * H:1 * H])
        f = jax.nn.sigmoid(gates[:, 1 * H:2 * H])
        g = jnp.tanh(gates[:, 2 * H:3 * H])
        o = jax.nn.sigmoid(gates[:, 3 * H:4 * H])
        c = f * c + i * g
        h = o * jnp.tanh(c)
        ys.append(h @ raw["w_d"].T + raw["b_d"])             # (1, 1)
    return jnp.concatenate(ys, axis=0).T                     # (1, seq_len)


# ----------------------------------- main -------------------------------------
if __name__ == "__main__":
    seq_len = 8
    input_dim = 4
    hidden_dim = 2 * input_dim   # as in the module: hidden_dim = 2 * input_dim
    # (output_dim=377 is stored by the PyTorch module but never used in forward.)

    key = jax.random.PRNGKey(0)
    kx, kp = jax.random.split(key)
    x = jax.random.normal(kx, (1, input_dim), jnp.float32)   # latent row vector

    raw, kparams = init_params(kp, input_dim, hidden_dim)

    out = decoder_forward(x, kparams, seq_len=seq_len, hidden_dim=hidden_dim)
    out = jax.block_until_ready(out)

    ref = jax.block_until_ready(
        decoder_ref(x, raw, seq_len=seq_len, hidden_dim=hidden_dim))

    assert out.shape == (1, seq_len), out.shape
    np.testing.assert_allclose(np.asarray(out), np.asarray(ref),
                               rtol=1e-4, atol=1e-5)
    print("KERNEL_OK")
</pallas_src>

<mosaic_0001>
module attributes {stable_mosaic.version = 11 : i64} {
  func.func @_decoder_kernel(%arg0: memref<1x4xf32, #tpu.memory_space<vmem>>, %arg1: memref<4x32xf32, #tpu.memory_space<vmem>>, %arg2: memref<8x32xf32, #tpu.memory_space<vmem>>, %arg3: memref<1x32xf32, #tpu.memory_space<vmem>>, %arg4: memref<1x8xf32, #tpu.memory_space<vmem>>, %arg5: memref<1x1xf32, #tpu.memory_space<vmem>>, %arg6: memref<1x8xf32, #tpu.memory_space<vmem>>) attributes {dimension_semantics = [], scalar_prefetch = 0 : i64, scratch_operands = 0 : i64, tpu.core_type = #tpu.core_type<tc>} {
    %c0 = arith.constant 0 : index
    %c0_0 = arith.constant 0 : index
    %0 = vector.load %arg0[%c0, %c0_0] : memref<1x4xf32, #tpu.memory_space<vmem>>, vector<1x4xf32>
    %c0_1 = arith.constant 0 : index
    %c0_2 = arith.constant 0 : index
    %1 = vector.load %arg2[%c0_1, %c0_2] : memref<8x32xf32, #tpu.memory_space<vmem>>, vector<8x32xf32>
    %c0_3 = arith.constant 0 : index
    %c0_4 = arith.constant 0 : index
    %2 = vector.load %arg4[%c0_3, %c0_4] : memref<1x8xf32, #tpu.memory_space<vmem>>, vector<1x8xf32>
    %c0_5 = arith.constant 0 : index
    %c0_6 = arith.constant 0 : index
    %3 = vector.load %arg1[%c0_5, %c0_6] : memref<4x32xf32, #tpu.memory_space<vmem>>, vector<4x32xf32>
    %cst = arith.constant dense<0.000000e+00> : vector<1x32xf32>
    %4 = tpu.matmul %0, %3, %cst {dimension_numbers = #tpu.dot_dimension_numbers<[1], [0], [0], [1], [0, 0, 1, 1], [], []>} : vector<1x4xf32>, vector<4x32xf32>, vector<1x32xf32> -> vector<1x32xf32>
    %c0_7 = arith.constant 0 : index
    %c0_8 = arith.constant 0 : index
    %5 = vector.load %arg3[%c0_7, %c0_8] : memref<1x32xf32, #tpu.memory_space<vmem>>, vector<1x32xf32>
    %6 = arith.addf %4, %5 : vector<1x32xf32>
    %7 = tpu.iota {dimensions = array<i32: 1>} : vector<1x8xi32>
    %cst_9 = arith.constant 0.000000e+00 : f32
    %8 = vector.broadcast %cst_9 : f32 to vector<1x8xf32>
    %cst_10 = arith.constant 0.000000e+00 : f32
    %9 = vector.broadcast %cst_10 : f32 to vector<1x8xf32>
    %cst_11 = arith.constant 0.000000e+00 : f32
    %10 = vector.broadcast %cst_11 : f32 to vector<1x8xf32>
    %cst_12 = arith.constant dense<0.000000e+00> : vector<1x32xf32>
    %11 = tpu.matmul %8, %1, %cst_12 {dimension_numbers = #tpu.dot_dimension_numbers<[1], [0], [0], [1], [0, 0, 1, 1], [], []>} : vector<1x8xf32>, vector<8x32xf32>, vector<1x32xf32> -> vector<1x32xf32>
    %12 = arith.addf %6, %11 : vector<1x32xf32>
    %13 = arith.negf %12 : vector<1x32xf32>
    %14 = math.exp %13 : vector<1x32xf32>
    %cst_13 = arith.constant 1.000000e+00 : f32
    %15 = vector.broadcast %cst_13 : f32 to vector<1x32xf32>
    %16 = arith.addf %15, %14 : vector<1x32xf32>
    %17 = arith.divf %15, %16 : vector<1x32xf32>
    %18 = vector.extract_strided_slice %12 {offsets = [0, 16], sizes = [1, 8], strides = [1, 1]} : vector<1x32xf32> to vector<1x8xf32>
    %19 = math.tanh %18 : vector<1x8xf32>
    %20 = vector.extract_strided_slice %17 {offsets = [0, 0], sizes = [1, 8], strides = [1, 1]} : vector<1x32xf32> to vector<1x8xf32>
    %21 = vector.extract_strided_slice %17 {offsets = [0, 8], sizes = [1, 8], strides = [1, 1]} : vector<1x32xf32> to vector<1x8xf32>
    %22 = vector.extract_strided_slice %17 {offsets = [0, 24], sizes = [1, 8], strides = [1, 1]} : vector<1x32xf32> to vector<1x8xf32>
    %23 = arith.mulf %21, %9 : vector<1x8xf32>
    %24 = arith.mulf %20, %19 : vector<1x8xf32>
    %25 = arith.addf %23, %24 : vector<1x8xf32>
    %26 = math.tanh %25 : vector<1x8xf32>
    %27 = arith.mulf %22, %26 : vector<1x8xf32>
    %28 = arith.mulf %27, %2 : vector<1x8xf32>
    %cst_14 = arith.constant dense<0.000000e+00> : vector<1xf32>
    %29 = vector.multi_reduction <add>, %28, %cst_14 [1] : vector<1x8xf32> to vector<1xf32>
    %30 = vector.shape_cast %29 : vector<1xf32> to vector<1x1xf32>
    %c0_i32 = arith.constant 0 : i32
    %31 = vector.broadcast %c0_i32 : i32 to vector<1x8xi32>
    %32 = arith.cmpi eq, %7, %31 : vector<1x8xi32>
    %cst_15 = arith.constant 0.000000e+00 : f32
    %33 = vector.shape_cast %30 : vector<1x1xf32> to vector<1x1xf32>
    %34 = vector.broadcast %33 : vector<1x1xf32> to vector<1x8xf32>
    %35 = vector.broadcast %cst_15 : f32 to vector<1x8xf32>
    %36 = arith.select %32, %34, %35 : vector<1x8xi1>, vector<1x8xf32>
    %37 = arith.addf %10, %36 : vector<1x8xf32>
    %cst_16 = arith.constant dense<0.000000e+00> : vector<1x32xf32>
    %38 = tpu.matmul %27, %1, %cst_16 {dimension_numbers = #tpu.dot_dimension_numbers<[1], [0], [0], [1], [0, 0, 1, 1], [], []>} : vector<1x8xf32>, vector<8x32xf32>, vector<1x32xf32> -> vector<1x32xf32>
    %39 = arith.addf %6, %38 : vector<1x32xf32>
    %40 = arith.negf %39 : vector<1x32xf32>
    %41 = math.exp %40 : vector<1x32xf32>
    %cst_17 = arith.constant 1.000000e+00 : f32
    %42 = vector.broadcast %cst_17 : f32 to vector<1x32xf32>
    %43 = arith.addf %42, %41 : vector<1x32xf32>
    %44 = arith.divf %42, %43 : vector<1x32xf32>
    %45 = vector.extract_strided_slice %39 {offsets = [0, 16], sizes = [1, 8], strides = [1, 1]} : vector<1x32xf32> to vector<1x8xf32>
    %46 = math.tanh %45 : vector<1x8xf32>
    %47 = vector.extract_strided_slice %44 {offsets = [0, 0], sizes = [1, 8], strides = [1, 1]} : vector<1x32xf32> to vector<1x8xf32>
    %48 = vector.extract_strided_slice %44 {offsets = [0, 8], sizes = [1, 8], strides = [1, 1]} : vector<1x32xf32> to vector<1x8xf32>
    %49 = vector.extract_strided_slice %44 {offsets = [0, 24], sizes = [1, 8], strides = [1, 1]} : vector<1x32xf32> to vector<1x8xf32>
    %50 = arith.mulf %48, %25 : vector<1x8xf32>
    %51 = arith.mulf %47, %46 : vector<1x8xf32>
    %52 = arith.addf %50, %51 : vector<1x8xf32>
    %53 = math.tanh %52 : vector<1x8xf32>
    %54 = arith.mulf %49, %53 : vector<1x8xf32>
    %55 = arith.mulf %54, %2 : vector<1x8xf32>
    %cst_18 = arith.constant dense<0.000000e+00> : vector<1xf32>
    %56 = vector.multi_reduction <add>, %55, %cst_18 [1] : vector<1x8xf32> to vector<1xf32>
    %57 = vector.shape_cast %56 : vector<1xf32> to vector<1x1xf32>
    %c1_i32 = arith.constant 1 : i32
    %58 = vector.broadcast %c1_i32 : i32 to vector<1x8xi32>
    %59 = arith.cmpi eq, %7, %58 : vector<1x8xi32>
    %cst_19 = arith.constant 0.000000e+00 : f32
    %60 = vector.shape_cast %57 : vector<1x1xf32> to vector<1x1xf32>
    %61 = vector.broadcast %60 : vector<1x1xf32> to vector<1x8xf32>
    %62 = vector.broadcast %cst_19 : f32 to vector<1x8xf32>
    %63 = arith.select %59, %61, %62 : vector<1x8xi1>, vector<1x8xf32>
    %64 = arith.addf %37, %63 : vector<1x8xf32>
    %cst_20 = arith.constant dense<0.000000e+00> : vector<1x32xf32>
    %65 = tpu.matmul %54, %1, %cst_20 {dimension_numbers = #tpu.dot_dimension_numbers<[1], [0], [0], [1], [0, 0, 1, 1], [], []>} : vector<1x8xf32>, vector<8x32xf32>, vector<1x32xf32> -> vector<1x32xf32>
    %66 = arith.addf %6, %65 : vector<1x32xf32>
    %67 = arith.negf %66 : vector<1x32xf32>
    %68 = math.exp %67 : vector<1x32xf32>
    %cst_21 = arith.constant 1.000000e+00 : f32
    %69 = vector.broadcast %cst_21 : f32 to vector<1x32xf32>
    %70 = arith.addf %69, %68 : vector<1x32xf32>
    %71 = arith.divf %69, %70 : vector<1x32xf32>
    %72 = vector.extract_strided_slice %66 {offsets = [0, 16], sizes = [1, 8], strides = [1, 1]} : vector<1x32xf32> to vector<1x8xf32>
    %73 = math.tanh %72 : vector<1x8xf32>
    %74 = vector.extract_strided_slice %71 {offsets = [0, 0], sizes = [1, 8], strides = [1, 1]} : vector<1x32xf32> to vector<1x8xf32>
    %75 = vector.extract_strided_slice %71 {offsets = [0, 8], sizes = [1, 8], strides = [1, 1]} : vector<1x32xf32> to vector<1x8xf32>
    %76 = vector.extract_strided_slice %71 {offsets = [0, 24], sizes = [1, 8], strides = [1, 1]} : vector<1x32xf32> to vector<1x8xf32>
    %77 = arith.mulf %75, %52 : vector<1x8xf32>
    %78 = arith.mulf %74, %73 : vector<1x8xf32>
    %79 = arith.addf %77, %78 : vector<1x8xf32>
    %80 = math.tanh %79 : vector<1x8xf32>
    %81 = arith.mulf %76, %80 : vector<1x8xf32>
    %82 = arith.mulf %81, %2 : vector<1x8xf32>
    %cst_22 = arith.constant dense<0.000000e+00> : vector<1xf32>
    %83 = vector.multi_reduction <add>, %82, %cst_22 [1] : vector<1x8xf32> to vector<1xf32>
    %84 = vector.shape_cast %83 : vector<1xf32> to vector<1x1xf32>
    %c2_i32 = arith.constant 2 : i32
    %85 = vector.broadcast %c2_i32 : i32 to vector<1x8xi32>
    %86 = arith.cmpi eq, %7, %85 : vector<1x8xi32>
    %cst_23 = arith.constant 0.000000e+00 : f32
    %87 = vector.shape_cast %84 : vector<1x1xf32> to vector<1x1xf32>
    %88 = vector.broadcast %87 : vector<1x1xf32> to vector<1x8xf32>
    %89 = vector.broadcast %cst_23 : f32 to vector<1x8xf32>
    %90 = arith.select %86, %88, %89 : vector<1x8xi1>, vector<1x8xf32>
    %91 = arith.addf %64, %90 : vector<1x8xf32>
    %cst_24 = arith.constant dense<0.000000e+00> : vector<1x32xf32>
    %92 = tpu.matmul %81, %1, %cst_24 {dimension_numbers = #tpu.dot_dimension_numbers<[1], [0], [0], [1], [0, 0, 1, 1], [], []>} : vector<1x8xf32>, vector<8x32xf32>, vector<1x32xf32> -> vector<1x32xf32>
    %93 = arith.addf %6, %92 : vector<1x32xf32>
    %94 = arith.negf %93 : vector<1x32xf32>
    %95 = math.exp %94 : vector<1x32xf32>
    %cst_25 = arith.constant 1.000000e+00 : f32
    %96 = vector.broadcast %cst_25 : f32 to vector<1x32xf32>
    %97 = arith.addf %96, %95 : vector<1x32xf32>
    %98 = arith.divf %96, %97 : vector<1x32xf32>
    %99 = vector.extract_strided_slice %93 {offsets = [0, 16], sizes = [1, 8], strides = [1, 1]} : vector<1x32xf32> to vector<1x8xf32>
    %100 = math.tanh %99 : vector<1x8xf32>
    %101 = vector.extract_strided_slice %98 {offsets = [0, 0], sizes = [1, 8], strides = [1, 1]} : vector<1x32xf32> to vector<1x8xf32>
    %102 = vector.extract_strided_slice %98 {offsets = [0, 8], sizes = [1, 8], strides = [1, 1]} : vector<1x32xf32> to vector<1x8xf32>
    %103 = vector.extract_strided_slice %98 {offsets = [0, 24], sizes = [1, 8], strides = [1, 1]} : vector<1x32xf32> to vector<1x8xf32>
    %104 = arith.mulf %102, %79 : vector<1x8xf32>
    %105 = arith.mulf %101, %100 : vector<1x8xf32>
    %106 = arith.addf %104, %105 : vector<1x8xf32>
    %107 = math.tanh %106 : vector<1x8xf32>
    %108 = arith.mulf %103, %107 : vector<1x8xf32>
    %109 = arith.mulf %108, %2 : vector<1x8xf32>
    %cst_26 = arith.constant dense<0.000000e+00> : vector<1xf32>
    %110 = vector.multi_reduction <add>, %109, %cst_26 [1] : vector<1x8xf32> to vector<1xf32>
    %111 = vector.shape_cast %110 : vector<1xf32> to vector<1x1xf32>
    %c3_i32 = arith.constant 3 : i32
    %112 = vector.broadcast %c3_i32 : i32 to vector<1x8xi32>
    %113 = arith.cmpi eq, %7, %112 : vector<1x8xi32>
    %cst_27 = arith.constant 0.000000e+00 : f32
    %114 = vector.shape_cast %111 : vector<1x1xf32> to vector<1x1xf32>
    %115 = vector.broadcast %114 : vector<1x1xf32> to vector<1x8xf32>
    %116 = vector.broadcast %cst_27 : f32 to vector<1x8xf32>
    %117 = arith.select %113, %115, %116 : vector<1x8xi1>, vector<1x8xf32>
    %118 = arith.addf %91, %117 : vector<1x8xf32>
    %cst_28 = arith.constant dense<0.000000e+00> : vector<1x32xf32>
    %119 = tpu.matmul %108, %1, %cst_28 {dimension_numbers = #tpu.dot_dimension_numbers<[1], [0], [0], [1], [0, 0, 1, 1], [], []>} : vector<1x8xf32>, vector<8x32xf32>, vector<1x32xf32> -> vector<1x32xf32>
    %120 = arith.addf %6, %119 : vector<1x32xf32>
    %121 = arith.negf %120 : vector<1x32xf32>
    %122 = math.exp %121 : vector<1x32xf32>
    %cst_29 = arith.constant 1.000000e+00 : f32
    %123 = vector.broadcast %cst_29 : f32 to vector<1x32xf32>
    %124 = arith.addf %123, %122 : vector<1x32xf32>
    %125 = arith.divf %123, %124 : vector<1x32xf32>
    %126 = vector.extract_strided_slice %120 {offsets = [0, 16], sizes = [1, 8], strides = [1, 1]} : vector<1x32xf32> to vector<1x8xf32>
    %127 = math.tanh %126 : vector<1x8xf32>
    %128 = vector.extract_strided_slice %125 {offsets = [0, 0], sizes = [1, 8], strides = [1, 1]} : vector<1x32xf32> to vector<1x8xf32>
    %129 = vector.extract_strided_slice %125 {offsets = [0, 8], sizes = [1, 8], strides = [1, 1]} : vector<1x32xf32> to vector<1x8xf32>
    %130 = vector.extract_strided_slice %125 {offsets = [0, 24], sizes = [1, 8], strides = [1, 1]} : vector<1x32xf32> to vector<1x8xf32>
    %131 = arith.mulf %129, %106 : vector<1x8xf32>
    %132 = arith.mulf %128, %127 : vector<1x8xf32>
    %133 = arith.addf %131, %132 : vector<1x8xf32>
    %134 = math.tanh %133 : vector<1x8xf32>
    %135 = arith.mulf %130, %134 : vector<1x8xf32>
    %136 = arith.mulf %135, %2 : vector<1x8xf32>
    %cst_30 = arith.constant dense<0.000000e+00> : vector<1xf32>
    %137 = vector.multi_reduction <add>, %136, %cst_30 [1] : vector<1x8xf32> to vector<1xf32>
    %138 = vector.shape_cast %137 : vector<1xf32> to vector<1x1xf32>
    %c4_i32 = arith.constant 4 : i32
    %139 = vector.broadcast %c4_i32 : i32 to vector<1x8xi32>
    %140 = arith.cmpi eq, %7, %139 : vector<1x8xi32>
    %cst_31 = arith.constant 0.000000e+00 : f32
    %141 = vector.shape_cast %138 : vector<1x1xf32> to vector<1x1xf32>
    %142 = vector.broadcast %141 : vector<1x1xf32> to vector<1x8xf32>
    %143 = vector.broadcast %cst_31 : f32 to vector<1x8xf32>
    %144 = arith.select %140, %142, %143 : vector<1x8xi1>, vector<1x8xf32>
    %145 = arith.addf %118, %144 : vector<1x8xf32>
    %cst_32 = arith.constant dense<0.000000e+00> : vector<1x32xf32>
    %146 = tpu.matmul %135, %1, %cst_32 {dimension_numbers = #tpu.dot_dimension_numbers<[1], [0], [0], [1], [0, 0, 1, 1], [], []>} : vector<1x8xf32>, vector<8x32xf32>, vector<1x32xf32> -> vector<1x32xf32>
    %147 = arith.addf %6, %146 : vector<1x32xf32>
    %148 = arith.negf %147 : vector<1x32xf32>
    %149 = math.exp %148 : vector<1x32xf32>
    %cst_33 = arith.constant 1.000000e+00 : f32
    %150 = vector.broadcast %cst_33 : f32 to vector<1x32xf32>
    %151 = arith.addf %150, %149 : vector<1x32xf32>
    %152 = arith.divf %150, %151 : vector<1x32xf32>
    %153 = vector.extract_strided_slice %147 {offsets = [0, 16], sizes = [1, 8], strides = [1, 1]} : vector<1x32xf32> to vector<1x8xf32>
    %154 = math.tanh %153 : vector<1x8xf32>
    %155 = vector.extract_strided_slice %152 {offsets = [0, 0], sizes = [1, 8], strides = [1, 1]} : vector<1x32xf32> to vector<1x8xf32>
    %156 = vector.extract_strided_slice %152 {offsets = [0, 8], sizes = [1, 8], strides = [1, 1]} : vector<1x32xf32> to vector<1x8xf32>
    %157 = vector.extract_strided_slice %152 {offsets = [0, 24], sizes = [1, 8], strides = [1, 1]} : vector<1x32xf32> to vector<1x8xf32>
    %158 = arith.mulf %156, %133 : vector<1x8xf32>
    %159 = arith.mulf %155, %154 : vector<1x8xf32>
    %160 = arith.addf %158, %159 : vector<1x8xf32>
    %161 = math.tanh %160 : vector<1x8xf32>
    %162 = arith.mulf %157, %161 : vector<1x8xf32>
    %163 = arith.mulf %162, %2 : vector<1x8xf32>
    %cst_34 = arith.constant dense<0.000000e+00> : vector<1xf32>
    %164 = vector.multi_reduction <add>, %163, %cst_34 [1] : vector<1x8xf32> to vector<1xf32>
    %165 = vector.shape_cast %164 : vector<1xf32> to vector<1x1xf32>
    %c5_i32 = arith.constant 5 : i32
    %166 = vector.broadcast %c5_i32 : i32 to vector<1x8xi32>
    %167 = arith.cmpi eq, %7, %166 : vector<1x8xi32>
    %cst_35 = arith.constant 0.000000e+00 : f32
    %168 = vector.shape_cast %165 : vector<1x1xf32> to vector<1x1xf32>
    %169 = vector.broadcast %168 : vector<1x1xf32> to vector<1x8xf32>
    %170 = vector.broadcast %cst_35 : f32 to vector<1x8xf32>
    %171 = arith.select %167, %169, %170 : vector<1x8xi1>, vector<1x8xf32>
    %172 = arith.addf %145, %171 : vector<1x8xf32>
    %cst_36 = arith.constant dense<0.000000e+00> : vector<1x32xf32>
    %173 = tpu.matmul %162, %1, %cst_36 {dimension_numbers = #tpu.dot_dimension_numbers<[1], [0], [0], [1], [0, 0, 1, 1], [], []>} : vector<1x8xf32>, vector<8x32xf32>, vector<1x32xf32> -> vector<1x32xf32>
    %174 = arith.addf %6, %173 : vector<1x32xf32>
    %175 = arith.negf %174 : vector<1x32xf32>
    %176 = math.exp %175 : vector<1x32xf32>
    %cst_37 = arith.constant 1.000000e+00 : f32
    %177 = vector.broadcast %cst_37 : f32 to vector<1x32xf32>
    %178 = arith.addf %177, %176 : vector<1x32xf32>
    %179 = arith.divf %177, %178 : vector<1x32xf32>
    %180 = vector.extract_strided_slice %174 {offsets = [0, 16], sizes = [1, 8], strides = [1, 1]} : vector<1x32xf32> to vector<1x8xf32>
    %181 = math.tanh %180 : vector<1x8xf32>
    %182 = vector.extract_strided_slice %179 {offsets = [0, 0], sizes = [1, 8], strides = [1, 1]} : vector<1x32xf32> to vector<1x8xf32>
    %183 = vector.extract_strided_slice %179 {offsets = [0, 8], sizes = [1, 8], strides = [1, 1]} : vector<1x32xf32> to vector<1x8xf32>
    %184 = vector.extract_strided_slice %179 {offsets = [0, 24], sizes = [1, 8], strides = [1, 1]} : vector<1x32xf32> to vector<1x8xf32>
    %185 = arith.mulf %183, %160 : vector<1x8xf32>
    %186 = arith.mulf %182, %181 : vector<1x8xf32>
    %187 = arith.addf %185, %186 : vector<1x8xf32>
    %188 = math.tanh %187 : vector<1x8xf32>
    %189 = arith.mulf %184, %188 : vector<1x8xf32>
    %190 = arith.mulf %189, %2 : vector<1x8xf32>
    %cst_38 = arith.constant dense<0.000000e+00> : vector<1xf32>
    %191 = vector.multi_reduction <add>, %190, %cst_38 [1] : vector<1x8xf32> to vector<1xf32>
    %192 = vector.shape_cast %191 : vector<1xf32> to vector<1x1xf32>
    %c6_i32 = arith.constant 6 : i32
    %193 = vector.broadcast %c6_i32 : i32 to vector<1x8xi32>
    %194 = arith.cmpi eq, %7, %193 : vector<1x8xi32>
    %cst_39 = arith.constant 0.000000e+00 : f32
    %195 = vector.shape_cast %192 : vector<1x1xf32> to vector<1x1xf32>
    %196 = vector.broadcast %195 : vector<1x1xf32> to vector<1x8xf32>
    %197 = vector.broadcast %cst_39 : f32 to vector<1x8xf32>
    %198 = arith.select %194, %196, %197 : vector<1x8xi1>, vector<1x8xf32>
    %199 = arith.addf %172, %198 : vector<1x8xf32>
    %cst_40 = arith.constant dense<0.000000e+00> : vector<1x32xf32>
    %200 = tpu.matmul %189, %1, %cst_40 {dimension_numbers = #tpu.dot_dimension_numbers<[1], [0], [0], [1], [0, 0, 1, 1], [], []>} : vector<1x8xf32>, vector<8x32xf32>, vector<1x32xf32> -> vector<1x32xf32>
    %201 = arith.addf %6, %200 : vector<1x32xf32>
    %202 = arith.negf %201 : vector<1x32xf32>
    %203 = math.exp %202 : vector<1x32xf32>
    %cst_41 = arith.constant 1.000000e+00 : f32
    %204 = vector.broadcast %cst_41 : f32 to vector<1x32xf32>
    %205 = arith.addf %204, %203 : vector<1x32xf32>
    %206 = arith.divf %204, %205 : vector<1x32xf32>
    %207 = vector.extract_strided_slice %201 {offsets = [0, 16], sizes = [1, 8], strides = [1, 1]} : vector<1x32xf32> to vector<1x8xf32>
    %208 = math.tanh %207 : vector<1x8xf32>
    %209 = vector.extract_strided_slice %206 {offsets = [0, 0], sizes = [1, 8], strides = [1, 1]} : vector<1x32xf32> to vector<1x8xf32>
    %210 = vector.extract_strided_slice %206 {offsets = [0, 8], sizes = [1, 8], strides = [1, 1]} : vector<1x32xf32> to vector<1x8xf32>
    %211 = vector.extract_strided_slice %206 {offsets = [0, 24], sizes = [1, 8], strides = [1, 1]} : vector<1x32xf32> to vector<1x8xf32>
    %212 = arith.mulf %210, %187 : vector<1x8xf32>
    %213 = arith.mulf %209, %208 : vector<1x8xf32>
    %214 = arith.addf %212, %213 : vector<1x8xf32>
    %215 = math.tanh %214 : vector<1x8xf32>
    %216 = arith.mulf %211, %215 : vector<1x8xf32>
    %217 = arith.mulf %216, %2 : vector<1x8xf32>
    %cst_42 = arith.constant dense<0.000000e+00> : vector<1xf32>
    %218 = vector.multi_reduction <add>, %217, %cst_42 [1] : vector<1x8xf32> to vector<1xf32>
    %219 = vector.shape_cast %218 : vector<1xf32> to vector<1x1xf32>
    %c7_i32 = arith.constant 7 : i32
    %220 = vector.broadcast %c7_i32 : i32 to vector<1x8xi32>
    %221 = arith.cmpi eq, %7, %220 : vector<1x8xi32>
    %cst_43 = arith.constant 0.000000e+00 : f32
    %222 = vector.shape_cast %219 : vector<1x1xf32> to vector<1x1xf32>
    %223 = vector.broadcast %222 : vector<1x1xf32> to vector<1x8xf32>
    %224 = vector.broadcast %cst_43 : f32 to vector<1x8xf32>
    %225 = arith.select %221, %223, %224 : vector<1x8xi1>, vector<1x8xf32>
    %226 = arith.addf %199, %225 : vector<1x8xf32>
    %c0_44 = arith.constant 0 : index
    %c0_45 = arith.constant 0 : index
    %227 = vector.load %arg5[%c0_44, %c0_45] : memref<1x1xf32, #tpu.memory_space<vmem>>, vector<1x1xf32>
    %228 = vector.broadcast %227 : vector<1x1xf32> to vector<1x8xf32>
    %229 = arith.addf %226, %228 : vector<1x8xf32>
    %c0_46 = arith.constant 0 : index
    %c0_47 = arith.constant 0 : index
    %230 = vector.load %arg6[%c0_46, %c0_47] : memref<1x8xf32, #tpu.memory_space<vmem>>, vector<1x8xf32>
    tpu.vector_store %arg6[%c0_46, %c0_47], %229 {strides = array<i32>} : memref<1x8xf32, #tpu.memory_space<vmem>>, vector<1x8xf32>,
    return
  }
}

</mosaic_0001>

<bundles_post_ra>
// kernel: tpu_custom_call.1
= control target key start
LH: loop header
LB: loop body
LE: loop exit
PB: predicated region body
PF: predicated region fallthrough
CT: control target
= control target key end

     0   :  { %s1476_s0 = inlined_call_operand.vmem [shape: f32[1,4], index: 0, kind: input, shape index: {}]   ;;  %s1477_s1 = inlined_call_operand.hbm [shape: f32[4,32], index: 1, kind: input, shape index: {}]   ;;  %s1478_s2 = inlined_call_operand.vmem [shape: f32[8,32], index: 2, kind: input, shape index: {}]   ;;  %s1479_s3 = inlined_call_operand.vmem [shape: f32[1,32], index: 3, kind: input, shape index: {}]   ;;  %s1480_s4 = inlined_call_operand.vmem [shape: f32[1,8], index: 4, kind: input, shape index: {}]   ;;  %s1481_s5 = inlined_call_operand.<no memory space> [shape: f32[1,1], index: 5, kind: input, shape index: {}]   ;;  %s1482_s6 = inlined_call_operand.hbm [shape: f32[1,8], index: 6, kind: output, shape index: {}]  }
   0x1   :  { %v11_v0 = vstv %s1481_s5 }
   0x2   :  { %12 = vst [vmem:[#allocation2] sm:$0x1] %v11_v0 }
   0x3   :  { %13 = vsyncpa [#allocation4], 0 }
   0x4   :  { %14 = vsyncpa [#allocation5], 0  ;;  %s1251_s23 = smov [#allocation3]   ;;  %s1203_s27 = scalar_lea.hbm %s1477_s1, 64 }
   0x5   :  { %s23_s24 = sshll.u32 %s1251_s23, 4  ;;  %p1204_p0 = scmp.ne.s32.totalorder %s1477_s1, %s1203_s27  ;;  %s24_s24 = int_to_ptr.vmem [resolvable:$true] %s23_s24 }
   0x6   :  { %p1207_p1 = scmp.lt.u32.totalorder %s1203_s27, %s1477_s1 }
   0x8   :  { %p1209_p2 = pnand %p1207_p1, %p1204_p0 }
   0xa   :  { %1212 = shalt.err (!%p1209_p2)
}
   0xb   :  { %s1213_s5 = scalar_lea.vmem %s24_s24, 64  ;;  %p1218_p4 = scmp.lt.s32.totalorder %s24_s24, %s24_s24 }
   0xc   :  { %p1214_p3 = scmp.ne.s32.totalorder %s24_s24, %s1213_s5  ;;  %p1219_p5 = scmp.lt.s32.totalorder %s1213_s5, %s1213_s5 }
   0xe   :  { %p1220_p6 = por %p1219_p5, %p1218_p4 }
  0x10   :  { %p1221_p7 = pnand %p1220_p6, %p1214_p3 }
  0x12   :  { %1224 = shalt.err (!%p1221_p7)
}
  0x13   :  { %26 = dma.hbm_to_vmem [thread:$0]  %s1477_s1, 64, %s24_s24, [#allocation4]  }
  0x14   :  { %1247 = dma.done.wait [#allocation4], 64  }
  0x15   :  { %1248 = vsyncadd [#allocation4], 4294967232  ;;  %v1252_v1 = vmov 0.0   ;;  %vm1253_vm0 = vmmov 0   ;;  %vm47_vm1 = vcmask 1043456   ;;  %vm43_vm2 = vcmask 31744  }
  0x16   :  { %1082 = vmatprep.subr.mxu0 %v1252_v1  ;;  %1084 = vmatprep.mubr.msk.f32.mxu0 %vm1253_vm0, %v1252_v1  ;;  %v41_v2 = vld [vmem:[#allocation3] sm:$0xf]  ;;  %v38_v3 = vld [vmem:[%s1476_s0] sm:$0x1]  ;;  %s1254_s13 = smov 112   ;;  %s1256_s14 = smov 16  }
  0x17   :  { %1087 = vmatprep.subr.mxu1 %v1252_v1  ;;  %1089 = vmatprep.mubr.msk.f32.mxu1 %vm1253_vm0, %v1252_v1  ;;  %v1323_v4 = vld [vmem:[%s1478_s2] sm:$0xff]  ;;  %s1257_s15 = smov 104   ;;  %vm123_vm3 = vcmask 64512   ;;  %s1258_s18 = smov 24   ;;  %vm235_vm4 = vcmask 57344  }
  0x18   :  { %1083 = vmatpush3.msk.msra.mxu0 %vm47_vm1, %v41_v2  ;;  %1088 = vmatpush3.msra.mxu1 %v1323_v4  ;;  %v42_v5 = vld [vmem:[%s1479_s3] sm:$0x1]  ;;  %s1255_s3 = smov 8  }
  0x19   :  { %1085 = vmatmul.mubr.msk.f32.vlgmr.msra.gmra.mrb[0].mxu0 %vm43_vm2, %v38_v3  ;;  %1090 = vmatmul.mubr.f32.vlgmr.msra.gmra.mrb[0].mxu1 %v1252_v1 }
  0x1a   :  { %1092 = vmatprep.subr.mxu0 %v1252_v1  ;;  %1094 = vmatprep.mubr.msk.f32.mxu0 %vm1253_vm0, %v1252_v1 }
  0x1b   :  { %1093 = vmatpush3.msra.mxu0 %v1323_v4  ;;  %1097 = vmatprep.subr.mxu1 %v1252_v1 }
  0x1c   :  { %1098 = vmatpush3.msra.mxu1 %v1323_v4  ;;  %1099 = vmatprep.mubr.msk.f32.mxu1 %vm1253_vm0, %v1252_v1 }
  0x1d   :  { %1102 = vmatprep.subr.mxu0 %v1252_v1  ;;  %1107 = vmatprep.subr.mxu1 %v1252_v1 }
  0xec   :  { %v117_v6 = vpop.f32.mrb[0].mxu0  ;;  %v193_v7 = vpop.f32.mrb[0].mxu1 }
  0xed   :  { %v1340_v8 = vadd.f32 %v117_v6, %v42_v5  ;;  %v1086_v9 = vpop.f32.mrb[1].mxu0  ;;  %v1091_v10 = vpop.f32.mrb[1].mxu1 }
  0xef   :  { %v197_v11 = vadd.f32 %v193_v7, %v1340_v8 }
  0xf1   :  { %1139 = vtanh.f32 %v197_v11  ;;  %v1048_v13 = vmul.f32 -1.442695, %v197_v11 }
  0xf3   :  { %1141 = vpow2.f32 %v1048_v13 }
  0xfb   :  { %v1140_v12 = vpop.eup %1139 }
  0xfc   :  { %207 = vrot.lane.b32.xlu0 %v1140_v12, %s1254_s13 }
  0xfd   :  { %v1142_v14 = vpop.eup %1141 }
  0xfe   :  { %v201_v15 = vadd.f32 1.0, %v1142_v14 }
 0x100   :  { %1143 = vrcp.f32 %v201_v15 }
 0x10a   :  { %v1144_v16 = vpop.eup %1143 }
 0x10b   :  { %v205_v19 = vmul.f32 0.0, %v1144_v16 }
 0x16e   :  { %v208_v17 = vpop.permute.xlu0 %207 }
 0x16f   :  { %v210_v18 = vmul.f32 %v1144_v16, %v208_v17 }
 0x171   :  { %212 = vrot.lane.b32.xlu0 %v210_v18, %s1255_s3 }
 0x1e3   :  { %v213_v20 = vpop.permute.xlu0 %212 }
 0x1e4   :  { %v215_v21 = vadd.f32 %v213_v20, %v205_v19 }
 0x1e6   :  { %1145 = vtanh.f32 %v215_v21 }
 0x1f0   :  { %v1146_v22 = vpop.eup %1145 }
 0x1f1   :  { %218 = vrot.lane.b32.xlu1 %v1146_v22, %s1256_s14 }
 0x263   :  { %v219_v23 = vpop.permute.xlu1 %218 }
 0x264   :  { %v1346_v24 = vmul.f32 %v1144_v16, %v219_v23 }
 0x266   :  { %243 = vrot.lane.b32.xlu1 %v1346_v24, %s1257_s15 }
 0x2d8   :  { %v244_v25 = vpop.permute.xlu1 %243 }
 0x2d9   :  { %1095 = vmatmul.mubr.msk.f32.vlgmr.msra.gmra.mrb[2].mxu0 %vm123_vm3, %v244_v25 }
 0x2da   :  { %1103 = vmatpush3.msra.mxu0 %v1323_v4  ;;  %1104 = vmatprep.mubr.msk.f32.mxu0 %vm1253_vm0, %v1252_v1 }
 0x2db   :  { %1112 = vmatprep.subr.mxu0 %v1252_v1 }
 0x3ac   :  { %v313_v26 = vpop.f32.mrb[2].mxu0 }
 0x3ad   :  { %v317_v27 = vadd.f32 %v313_v26, %v1340_v8  ;;  %v1096_v28 = vpop.f32.mrb[3].mxu0 }
 0x3af   :  { %1147 = vtanh.f32 %v317_v27  ;;  %v1051_v30 = vmul.f32 -1.442695, %v317_v27 }
 0x3b1   :  { %1149 = vpow2.f32 %v1051_v30 }
 0x3b9   :  { %v1148_v29 = vpop.eup %1147 }
 0x3ba   :  { %327 = vrot.lane.b32.xlu0 %v1148_v29, %s1254_s13 }
 0x3bb   :  { %v1150_v31 = vpop.eup %1149 }
 0x3bc   :  { %v321_v32 = vadd.f32 1.0, %v1150_v31 }
 0x3be   :  { %1151 = vrcp.f32 %v321_v32 }
 0x3c8   :  { %v1152_v33 = vpop.eup %1151 }
 0x3c9   :  { %v325_v36 = vmul.f32 %v1152_v33, %v215_v21 }
 0x42c   :  { %v328_v34 = vpop.permute.xlu0 %327 }
 0x42d   :  { %v330_v35 = vmul.f32 %v1152_v33, %v328_v34 }
 0x42f   :  { %332 = vrot.lane.b32.xlu1 %v330_v35, %s1255_s3 }
 0x4a1   :  { %v333_v37 = vpop.permute.xlu1 %332 }
 0x4a2   :  { %v335_v38 = vadd.f32 %v333_v37, %v325_v36 }
 0x4a4   :  { %1153 = vtanh.f32 %v335_v38 }
 0x4ae   :  { %v1154_v39 = vpop.eup %1153 }
 0x4af   :  { %338 = vrot.lane.b32.xlu0 %v1154_v39, %s1256_s14 }
 0x521   :  { %v339_v40 = vpop.permute.xlu0 %338 }
 0x522   :  { %v1359_v41 = vmul.f32 %v1152_v33, %v339_v40 }
 0x524   :  { %354 = vrot.lane.b32.xlu1 %v1359_v41, %s1257_s15 }
 0x596   :  { %v355_v42 = vpop.permute.xlu1 %354 }
 0x597   :  { %1100 = vmatmul.mubr.msk.f32.vlgmr.msra.gmra.mrb[2].mxu1 %vm123_vm3, %v355_v42 }
 0x598   :  { %1108 = vmatpush3.msra.mxu1 %v1323_v4  ;;  %1109 = vmatprep.mubr.msk.f32.mxu1 %vm1253_vm0, %v1252_v1 }
 0x599   :  { %1117 = vmatprep.subr.mxu1 %v1252_v1 }
 0x66a   :  { %v424_v43 = vpop.f32.mrb[2].mxu1 }
 0x66b   :  { %v428_v44 = vadd.f32 %v424_v43, %v1340_v8  ;;  %v1101_v45 = vpop.f32.mrb[3].mxu1 }
 0x66d   :  { %1155 = vtanh.f32 %v428_v44  ;;  %v1053_v47 = vmul.f32 -1.442695, %v428_v44 }
 0x66f   :  { %1157 = vpow2.f32 %v1053_v47 }
 0x677   :  { %v1156_v46 = vpop.eup %1155 }
 0x678   :  { %438 = vrot.lane.b32.xlu0 %v1156_v46, %s1254_s13 }
 0x679   :  { %v1158_v48 = vpop.eup %1157 }
 0x67a   :  { %v432_v49 = vadd.f32 1.0, %v1158_v48 }
 0x67c   :  { %1159 = vrcp.f32 %v432_v49 }
 0x686   :  { %v1160_v50 = vpop.eup %1159 }
 0x687   :  { %v436_v53 = vmul.f32 %v1160_v50, %v335_v38 }
 0x6ea   :  { %v439_v51 = vpop.permute.xlu0 %438 }
 0x6eb   :  { %v441_v52 = vmul.f32 %v1160_v50, %v439_v51 }
 0x6ed   :  { %443 = vrot.lane.b32.xlu1 %v441_v52, %s1255_s3 }
 0x75f   :  { %v444_v54 = vpop.permute.xlu1 %443 }
 0x760   :  { %v446_v55 = vadd.f32 %v444_v54, %v436_v53 }
 0x762   :  { %1161 = vtanh.f32 %v446_v55 }
 0x76c   :  { %v1162_v56 = vpop.eup %1161 }
 0x76d   :  { %449 = vrot.lane.b32.xlu0 %v1162_v56, %s1256_s14 }
 0x7df   :  { %v450_v57 = vpop.permute.xlu0 %449 }
 0x7e0   :  { %v1372_v58 = vmul.f32 %v1160_v50, %v450_v57 }
 0x7e2   :  { %465 = vrot.lane.b32.xlu1 %v1372_v58, %s1257_s15 }
 0x854   :  { %v466_v59 = vpop.permute.xlu1 %465 }
 0x855   :  { %1105 = vmatmul.mubr.msk.f32.vlgmr.msra.gmra.mrb[4].mxu0 %vm123_vm3, %v466_v59 }
 0x856   :  { %1113 = vmatpush3.msra.mxu0 %v1323_v4  ;;  %1114 = vmatprep.mubr.msk.f32.mxu0 %vm1253_vm0, %v1252_v1 }
 0x857   :  { %1122 = vmatprep.subr.mxu0 %v1252_v1 }
 0x928   :  { %v535_v60 = vpop.f32.mrb[4].mxu0 }
 0x929   :  { %v539_v61 = vadd.f32 %v535_v60, %v1340_v8  ;;  %v1106_v62 = vpop.f32.mrb[5].mxu0 }
 0x92b   :  { %1163 = vtanh.f32 %v539_v61  ;;  %v1055_v0 = vmul.f32 -1.442695, %v539_v61 }
 0x92d   :  { %1165 = vpow2.f32 %v1055_v0 }
 0x935   :  { %v1164_v63 = vpop.eup %1163 }
 0x936   :  { %549 = vrot.lane.b32.xlu0 %v1164_v63, %s1254_s13 }
 0x937   :  { %v1166_v2 = vpop.eup %1165 }
 0x938   :  { %v543_v3 = vadd.f32 1.0, %v1166_v2 }
 0x93a   :  { %1167 = vrcp.f32 %v543_v3 }
 0x944   :  { %v1168_v5 = vpop.eup %1167 }
 0x945   :  { %v547_v9 = vmul.f32 %v1168_v5, %v446_v55 }
 0x9a8   :  { %v550_v6 = vpop.permute.xlu0 %549 }
 0x9a9   :  { %v552_v7 = vmul.f32 %v1168_v5, %v550_v6 }
 0x9ab   :  { %554 = vrot.lane.b32.xlu1 %v552_v7, %s1255_s3 }
 0xa1d   :  { %v555_v10 = vpop.permute.xlu1 %554 }
 0xa1e   :  { %v557_v11 = vadd.f32 %v555_v10, %v547_v9 }
 0xa20   :  { %1169 = vtanh.f32 %v557_v11 }
 0xa2a   :  { %v1170_v12 = vpop.eup %1169 }
 0xa2b   :  { %560 = vrot.lane.b32.xlu0 %v1170_v12, %s1256_s14 }
 0xa9d   :  { %v561_v13 = vpop.permute.xlu0 %560 }
 0xa9e   :  { %v1385_v14 = vmul.f32 %v1168_v5, %v561_v13 }
 0xaa0   :  { %576 = vrot.lane.b32.xlu1 %v1385_v14, %s1257_s15 }
 0xb12   :  { %v577_v15 = vpop.permute.xlu1 %576 }
 0xb13   :  { %1110 = vmatmul.mubr.msk.f32.vlgmr.msra.gmra.mrb[4].mxu1 %vm123_vm3, %v577_v15 }
 0xb14   :  { %1118 = vmatpush3.msra.mxu1 %v1323_v4  ;;  %1119 = vmatprep.mubr.msk.f32.mxu1 %vm1253_vm0, %v1252_v1 }
 0xbe6   :  { %v646_v16 = vpop.f32.mrb[4].mxu1 }
 0xbe7   :  { %v650_v17 = vadd.f32 %v646_v16, %v1340_v8  ;;  %v1111_v18 = vpop.f32.mrb[5].mxu1 }
 0xbe9   :  { %1171 = vtanh.f32 %v650_v17  ;;  %v1057_v20 = vmul.f32 -1.442695, %v650_v17 }
 0xbeb   :  { %1173 = vpow2.f32 %v1057_v20 }
 0xbf3   :  { %v1172_v19 = vpop.eup %1171 }
 0xbf4   :  { %660 = vrot.lane.b32.xlu0 %v1172_v19, %s1254_s13 }
 0xbf5   :  { %v1174_v21 = vpop.eup %1173 }
 0xbf6   :  { %v654_v22 = vadd.f32 1.0, %v1174_v21 }
 0xbf8   :  { %1175 = vrcp.f32 %v654_v22 }
 0xc02   :  { %v1176_v23 = vpop.eup %1175 }
 0xc03   :  { %v658_v27 = vmul.f32 %v1176_v23, %v557_v11  ;;  %v1049_v11 = vld [vmem:[%s1480_s4] ss:$0 sm:$0xff]  ;;  %s1260_s4 = smov [#allocation6]  }
 0xc04   :  { %s1037_s19 = sshll.u32 %s1260_s4, 4  ;;  %s1038_s19 = int_to_ptr.vmem [resolvable:$true] %s1037_s19 }
 0xc05   :  { %s1225_s20 = scalar_lea.vmem %s1038_s19, 16  ;;  %s1229_s21 = scalar_lea.vmem %s1038_s19, 32 }
 0xc06   :  { %p1226_p8 = scmp.ne.s32.totalorder %s1038_s19, %s1225_s20  ;;  %p1230_p9 = scmp.lt.s32.totalorder %s1038_s19, %s1038_s19 }
 0xc07   :  { %p1231_p10 = scmp.lt.s32.totalorder %s1229_s21, %s1225_s20 }
 0xc09   :  { %p1232_p11 = por %p1231_p10, %p1230_p9 }
 0xc0b   :  { %p1233_p12 = pnand %p1232_p11, %p1226_p8 }
 0xc66   :  { %v661_v25 = vpop.permute.xlu0 %660 }
 0xc67   :  { %v663_v26 = vmul.f32 %v1176_v23, %v661_v25 }
 0xc69   :  { %665 = vrot.lane.b32.xlu1 %v663_v26, %s1255_s3 }
 0xcdb   :  { %v666_v28 = vpop.permute.xlu1 %665 }
 0xcdc   :  { %v668_v29 = vadd.f32 %v666_v28, %v658_v27 }
 0xcde   :  { %1177 = vtanh.f32 %v668_v29 }
 0xce8   :  { %v1178_v30 = vpop.eup %1177 }
 0xce9   :  { %671 = vrot.lane.b32.xlu0 %v1178_v30, %s1256_s14  ;;  %v121_v30 = vlaneseq }
 0xd5b   :  { %v672_v31 = vpop.permute.xlu0 %671 }
 0xd5c   :  { %v1397_v32 = vmul.f32 %v1176_v23, %v672_v31  ;;  %v1440_v31 = vand.u32 127, %v121_v30 }
 0xd5e   :  { %687 = vrot.lane.b32.xlu1 %v1397_v32, %s1257_s15  ;;  %vm239_vm5 = vcmp.eq.s32.totalorder %v1440_v31, 0  ;;  %vm350_vm6 = vcmp.eq.s32.totalorder %v1440_v31, 1  ;;  %vm461_vm7 = vcmp.eq.s32.totalorder %v1440_v31, 2  ;;  %vm572_vm8 = vcmp.eq.s32.totalorder %v1440_v31, 3 }
 0xd5f   :  { %vm683_vm9 = vcmp.eq.s32.totalorder %v1440_v31, 4  ;;  %vm794_vm10 = vcmp.eq.s32.totalorder %v1440_v31, 5  ;;  %vm905_vm11 = vcmp.eq.s32.totalorder %v1440_v31, 6  ;;  %vm1016_vm12 = vcmp.eq.s32.totalorder %v1440_v31, 7 }
 0xdd0   :  { %v688_v33 = vpop.permute.xlu1 %687 }
 0xdd1   :  { %1115 = vmatmul.mubr.msk.f32.vlgmr.msra.gmra.mrb[6].mxu0 %vm123_vm3, %v688_v33 }
 0xdd2   :  { %1123 = vmatpush3.msra.mxu0 %v1323_v4  ;;  %1124 = vmatprep.mubr.msk.f32.mxu0 %vm1253_vm0, %v1252_v1 }
 0xea4   :  { %v757_v34 = vpop.f32.mrb[6].mxu0 }
 0xea5   :  { %v761_v35 = vadd.f32 %v757_v34, %v1340_v8  ;;  %v1116_v36 = vpop.f32.mrb[7].mxu0 }
 0xea7   :  { %1179 = vtanh.f32 %v761_v35  ;;  %v1059_v38 = vmul.f32 -1.442695, %v761_v35 }
 0xea9   :  { %1181 = vpow2.f32 %v1059_v38 }
 0xeb1   :  { %v1180_v37 = vpop.eup %1179 }
 0xeb2   :  { %771 = vrot.lane.b32.xlu0 %v1180_v37, %s1254_s13 }
 0xeb3   :  { %v1182_v39 = vpop.eup %1181 }
 0xeb4   :  { %v765_v40 = vadd.f32 1.0, %v1182_v39 }
 0xeb6   :  { %1183 = vrcp.f32 %v765_v40 }
 0xec0   :  { %v1184_v42 = vpop.eup %1183 }
 0xec1   :  { %v769_v4 = vmul.f32 %v1184_v42, %v668_v29 }
 0xf24   :  { %v772_v43 = vpop.permute.xlu0 %771 }
 0xf25   :  { %v774_v44 = vmul.f32 %v1184_v42, %v772_v43 }
 0xf27   :  { %776 = vrot.lane.b32.xlu1 %v774_v44, %s1255_s3 }
 0xf99   :  { %v777_v1 = vpop.permute.xlu1 %776 }
 0xf9a   :  { %v779_v45 = vadd.f32 %v777_v1, %v769_v4 }
 0xf9c   :  { %1185 = vtanh.f32 %v779_v45 }
 0xfa6   :  { %v1186_v46 = vpop.eup %1185 }
 0xfa7   :  { %782 = vrot.lane.b32.xlu0 %v1186_v46, %s1256_s14 }
0x1019   :  { %v783_v47 = vpop.permute.xlu0 %782 }
0x101a   :  { %v1409_v48 = vmul.f32 %v1184_v42, %v783_v47 }
0x101c   :  { %798 = vrot.lane.b32.xlu1 %v1409_v48, %s1257_s15 }
0x108e   :  { %v799_v49 = vpop.permute.xlu1 %798 }
0x108f   :  { %1120 = vmatmul.mubr.msk.f32.vlgmr.msra.gmra.mrb[6].mxu1 %vm123_vm3, %v799_v49 }
0x1162   :  { %v868_v50 = vpop.f32.mrb[6].mxu1 }
0x1163   :  { %v872_v51 = vadd.f32 %v868_v50, %v1340_v8  ;;  %v1121_v52 = vpop.f32.mrb[7].mxu1 }
0x1165   :  { %1187 = vtanh.f32 %v872_v51  ;;  %v1061_v54 = vmul.f32 -1.442695, %v872_v51 }
0x1167   :  { %1189 = vpow2.f32 %v1061_v54 }
0x116f   :  { %v1188_v53 = vpop.eup %1187 }
0x1170   :  { %882 = vrot.lane.b32.xlu0 %v1188_v53, %s1254_s13 }
0x1171   :  { %v1190_v55 = vpop.eup %1189 }
0x1172   :  { %v876_v56 = vadd.f32 1.0, %v1190_v55 }
0x1174   :  { %1191 = vrcp.f32 %v876_v56 }
0x117e   :  { %v1192_v57 = vpop.eup %1191 }
0x117f   :  { %v880_v61 = vmul.f32 %v1192_v57, %v779_v45  ;;  %v1259_v45 = vmov 0  }
0x1180   :  { %1137 = vset.pattern.permute.xlu1 %v1259_v45  ;;  %1138 = vset.pattern.permute.xlu0 %v1259_v45 }
0x11e2   :  { %v883_v59 = vpop.permute.xlu0 %882 }
0x11e3   :  { %v885_v60 = vmul.f32 %v1192_v57, %v883_v59 }
0x11e5   :  { %887 = vrot.lane.b32.xlu1 %v885_v60, %s1255_s3  ;;  %v1019_v60 = vld [vmem:[#allocation2] sm:$0x1] }
0x1257   :  { %v888_v62 = vpop.permute.xlu1 %887 }
0x1258   :  { %v890_v63 = vadd.f32 %v888_v62, %v880_v61 }
0x125a   :  { %1193 = vtanh.f32 %v890_v63 }
0x1264   :  { %v1194_v0 = vpop.eup %1193 }
0x1265   :  { %893 = vrot.lane.b32.xlu0 %v1194_v0, %s1256_s14 }
0x12d7   :  { %v894_v2 = vpop.permute.xlu0 %893 }
0x12d8   :  { %v1418_v3 = vmul.f32 %v1192_v57, %v894_v2 }
0x12da   :  { %909 = vrot.lane.b32.xlu1 %v1418_v3, %s1257_s15 }
0x134c   :  { %v910_v5 = vpop.permute.xlu1 %909 }
0x134d   :  { %1125 = vmatmul.mubr.msk.f32.vlgmr.msra.gmra.mrb[8].mxu0 %vm123_vm3, %v910_v5 }
0x1420   :  { %v979_v6 = vpop.f32.mrb[8].mxu0 }
0x1421   :  { %v983_v7 = vadd.f32 %v979_v6, %v1340_v8  ;;  %v1126_v9 = vpop.f32.mrb[9].mxu0 }
0x1423   :  { %1195 = vtanh.f32 %v983_v7  ;;  %v1063_v12 = vmul.f32 -1.442695, %v983_v7 }
0x1425   :  { %1197 = vpow2.f32 %v1063_v12 }
0x142d   :  { %v1196_v10 = vpop.eup %1195 }
0x142e   :  { %993 = vrot.lane.b32.xlu0 %v1196_v10, %s1254_s13 }
0x142f   :  { %v1198_v13 = vpop.eup %1197 }
0x1430   :  { %v987_v15 = vadd.f32 1.0, %v1198_v13 }
0x1432   :  { %227 = vrot.lane.b32.xlu0 %v1049_v11, %s1258_s18  ;;  %1199 = vrcp.f32 %v987_v15 }
0x143c   :  { %v1200_v16 = vpop.eup %1199 }
0x143d   :  { %v991_v27 = vmul.f32 %v1200_v16, %v890_v63  ;;  %v1026_v63 = vshrl.u32 %v121_v30, 7 }
0x143f   :  { %v1027_v6 = vsub.s32 0, %v1026_v63 }
0x14a0   :  { %v994_v17 = vpop.permute.xlu0 %993 }
0x14a1   :  { %v996_v18 = vmul.f32 %v1200_v16, %v994_v17 }
0x14a3   :  { %998 = vrot.lane.b32.xlu1 %v996_v18, %s1255_s3 }
0x14a4   :  { %v228_v8 = vpop.permute.xlu0 %227 }
0x14a5   :  { %v230_v19 = vmul.f32 %v228_v8, %v1346_v24  ;;  %v342_v20 = vmul.f32 %v1359_v41, %v228_v8  ;;  %v453_v24 = vmul.f32 %v1372_v58, %v228_v8  ;;  %v564_v41 = vmul.f32 %v1385_v14, %v228_v8 }
0x14a6   :  { %v786_v40 = vmul.f32 %v1409_v48, %v228_v8  ;;  %v675_v42 = vmul.f32 %v1397_v32, %v228_v8  ;;  %v897_v4 = vmul.f32 %v1418_v3, %v228_v8 }
0x14a7   :  { %232 = vrot.lane.b32.xlu1 %v230_v19, %s1257_s15 }
0x14ab   :  { %344 = vrot.lane.b32.xlu1 %v342_v20, %s1257_s15 }
0x1515   :  { %v999_v21 = vpop.permute.xlu1 %998 }
0x1516   :  { %v1001_v28 = vadd.f32 %v999_v21, %v991_v27 }
0x1518   :  { %1201 = vtanh.f32 %v1001_v28 }
0x1519   :  { %v233_v22 = vpop.permute.xlu1 %232 }
0x151a   :  { %v236_v23 = vsel %vm235_vm4, %v233_v22, 0.0 }
0x151b   :  { %237 = vadd.xlane.f32.xlu0 %v236_v23 }
0x151d   :  { %v345_v25 = vpop.permute.xlu1 %344 }
0x151e   :  { %v347_v26 = vsel %vm235_vm4, %v345_v25, 0.0 }
0x151f   :  { %348 = vadd.xlane.f32.xlu1 %v347_v26 }
0x1522   :  { %v1202_v29 = vpop.eup %1201 }
0x1530   :  { %455 = vrot.lane.b32.xlu1 %v453_v24, %s1257_s15 }
0x1531   :  { %1004 = vrot.lane.b32.xlu0 %v1202_v29, %s1256_s14 }
0x1534   :  { %566 = vrot.lane.b32.xlu1 %v564_v41, %s1257_s15 }
0x15a8   :  { %v238_v33 = vpop.xlane.xlu0 %237 }
0x15a9   :  { %v240_v35 = vsel %vm239_vm5, %v238_v33, 0.0 }
0x15ac   :  { %v349_v34 = vpop.xlane.xlu1 %348  ;;  %v1005_v43 = vpop.permute.xlu0 %1004 }
0x15ad   :  { %v351_v58 = vsel %vm350_vm6, %v349_v34, 0.0  ;;  %v1007_v44 = vmul.f32 %v1200_v16, %v1005_v43 }
0x15ae   :  { %v352_v36 = vadd.f32 %v351_v58, %v240_v35 }
0x15af   :  { %v1008_v1 = vmul.f32 %v1007_v44, %v228_v8 }
0x15b0   :  { %v456_v37 = vpop.permute.xlu1 %455 }
0x15b1   :  { %v458_v38 = vsel %vm235_vm4, %v456_v37, 0.0 }
0x15b2   :  { %459 = vadd.xlane.f32.xlu0 %v458_v38 }
0x15b4   :  { %v567_v39 = vpop.permute.xlu1 %566 }
0x15b5   :  { %v569_v14 = vsel %vm235_vm4, %v567_v39, 0.0 }
0x15b6   :  { %570 = vadd.xlane.f32.xlu1 %v569_v14 }
0x15c7   :  { %788 = vrot.lane.b32.xlu1 %v786_v40, %s1257_s15 }
0x15c8   :  { %677 = vrot.lane.b32.xlu0 %v675_v42, %s1257_s15 }
0x15cc   :  { %899 = vrot.lane.b32.xlu0 %v897_v4, %s1257_s15 }
0x15d0   :  { %1010 = vrot.lane.b32.xlu0 %v1008_v1, %s1257_s15 }
0x163f   :  { %v460_v46 = vpop.xlane.xlu0 %459 }
0x1640   :  { %v462_v32 = vsel %vm461_vm7, %v460_v46, 0.0 }
0x1641   :  { %v463_v47 = vadd.f32 %v462_v32, %v352_v36 }
0x1643   :  { %v571_v48 = vpop.xlane.xlu1 %570  ;;  %v678_v49 = vpop.permute.xlu0 %677 }
0x1644   :  { %v573_v50 = vsel %vm572_vm8, %v571_v48, 0.0  ;;  %v680_v51 = vsel %vm235_vm4, %v678_v49, 0.0 }
0x1645   :  { %v574_v52 = vadd.f32 %v573_v50, %v463_v47  ;;  %681 = vadd.xlane.f32.xlu0 %v680_v51 }
0x1647   :  { %v789_v53 = vpop.permute.xlu1 %788  ;;  %v900_v54 = vpop.permute.xlu0 %899 }
0x1648   :  { %v791_v55 = vsel %vm235_vm4, %v789_v53, 0.0  ;;  %v902_v56 = vsel %vm235_vm4, %v900_v54, 0.0 }
0x1649   :  { %792 = vadd.xlane.f32.xlu1 %v791_v55  ;;  %903 = vadd.xlane.f32.xlu0 %v902_v56 }
0x164b   :  { %v1011_v57 = vpop.permute.xlu0 %1010 }
0x164c   :  { %v1013_v59 = vsel %vm235_vm4, %v1011_v57, 0.0 }
0x164d   :  { %1014 = vadd.xlane.f32.xlu0 %v1013_v59 }
0x165a   :  { %1022 = vperm.xlu1 %1137, %v1019_v60  }
0x16d2   :  { %v682_v61 = vpop.xlane.xlu0 %681 }
0x16d3   :  { %v684_v62 = vsel %vm683_vm9, %v682_v61, 0.0 }
0x16d4   :  { %v685_v0 = vadd.f32 %v684_v62, %v574_v52 }
0x16d6   :  { %v793_v2 = vpop.xlane.xlu1 %792  ;;  %v904_v3 = vpop.xlane.xlu0 %903 }
0x16d7   :  { %v795_v5 = vsel %vm794_vm10, %v793_v2, 0.0  ;;  %v906_v9 = vsel %vm905_vm11, %v904_v3, 0.0 }
0x16d8   :  { %v796_v7 = vadd.f32 %v795_v5, %v685_v0 }
0x16da   :  { %v907_v10 = vadd.f32 %v906_v9, %v796_v7  ;;  %v1015_v11 = vpop.xlane.xlu0 %1014  ;;  %v1023_v12 = vpop.permute.xlu1 %1022 }
0x16db   :  { %v1017_v13 = vsel %vm1016_vm12, %v1015_v11, 0.0  ;;  %v1028_v15 = vrot.slane %v1023_v12, %v1027_v6 }
0x16dc   :  { %v1018_v16 = vadd.f32 %v1017_v13, %v907_v10 }
0x16de   :  { %v1029_v17 = vadd.f32 %v1028_v15, %v1018_v16 }
0x16e0   :  { %1030 = vst.msk [vmem:[#allocation6] sm:$0x1] %vm235_vm4, %v1029_v17 }
0x16e1   :  { %1236 = shalt.err (!%p1233_p12)
}
0x16e2   :  { %s1237_s24 = scalar_lea.hbm %s1482_s6, 16 }
0x16e3   :  { %p1238_p13 = scmp.ne.s32.totalorder %s1482_s6, %s1237_s24  ;;  %p1241_p0 = scmp.lt.u32.totalorder %s1237_s24, %s1482_s6 }
0x16e5   :  { %p1243_p1 = pnand %p1241_p0, %p1238_p13 }
0x16e7   :  { %1246 = shalt.err (!%p1243_p1)
}
0x16e8   :  { %1040 = dma.vmem_to_hbm [thread:$0]  %s1038_s19, 16, %s1482_s6, [#allocation5]  }
0x16e9   :  { %1249 = dma.done.wait [#allocation5], 16  }
0x16ea   :  { %1250 = vsyncadd [#allocation5], 4294967280 }
0x16eb   :  { %1044 = vsyncpa [#allocation4], 1 }
0x16ec   :  { %1045 = vsyncpa [#allocation5], 1 }

</bundles_post_ra>
